<compile_context>
chip_gen: v5e
topology: v5e:2x2
jax: 0.10.0
libtpu: 0.0.40
codegen_flags: <defaults>
</compile_context>

<pallas_src>
import numpy as np
import jax
import jax.numpy as jnp
from jax.experimental import pallas as pl
from jax.experimental.pallas import tpu as pltpu

_LANES = 128
_SUBLANES = 8


def _round_up(x, m):
    return (x + m - 1) // m * m


def _plan_case(a_shape, b_shape):
    """Static (trace-time) plan for one torch.matmul(a, b)."""
    a_1d = len(a_shape) == 1
    b_1d = len(b_shape) == 1
    ash = (1,) + tuple(a_shape) if a_1d else tuple(a_shape)
    bsh = tuple(b_shape) + (1,) if b_1d else tuple(b_shape)
    M, K = ash[-2], ash[-1]
    N = bsh[-1]
    a_batch, b_batch = ash[:-2], bsh[:-2]
    o_batch = tuple(np.broadcast_shapes(a_batch, b_batch))
    nb = len(o_batch)
    ab = (1,) * (nb - len(a_batch)) + tuple(a_batch)
    bb = (1,) * (nb - len(b_batch)) + tuple(b_batch)

    # Longest batch-suffix foldable into M (rhs broadcast there) or into N
    # (lhs broadcast there).  Remaining leading batch dims become a short,
    # statically unrolled loop of dots inside the kernel.
    s_m = 0
    while s_m < nb and bb[nb - 1 - s_m] == 1:
        s_m += 1
    s_n = 0
    while s_n < nb and ab[nb - 1 - s_n] == 1:
        s_n += 1
    if s_m >= s_n:
        fold, s = "M", s_m
    else:
        fold, s = "N", s_n

    outer, folded = o_batch[:nb - s], o_batch[nb - s:]
    n_outer = int(np.prod(outer, dtype=np.int64)) if outer else 1
    n_fold = int(np.prod(folded, dtype=np.int64)) if folded else 1

    if fold == "M":
        dm, dn = n_fold * M, N
    else:
        dm, dn = M, n_fold * N

    vpu = (fold == "M") and (N == 1) and (n_outer == 1)

    return dict(a_1d=a_1d, b_1d=b_1d, M=M, K=K, N=N, ab=ab, bb=bb,
                o_batch=o_batch, outer=outer, folded=folded, fold=fold, s=s,
                n_outer=n_outer, n_fold=n_fold, dm=dm, dn=dn, vpu=vpu)


def _prep_operands(a, b, p):
    """Wrapper-side (XLA) reshape/transpose of a, b into 2-D slab row blocks."""
    M, K, N = p["M"], p["K"], p["N"]
    outer, folded, s = p["outer"], p["folded"], p["s"]
    nb = len(p["o_batch"])
    aa = a.reshape(p["ab"] + (M, K))
    b2 = b.reshape(p["bb"] + (K, N))

    if p["fold"] == "M":
        lhs2d = jnp.broadcast_to(aa, outer + folded + (M, K)).reshape(
            p["n_outer"] * p["n_fold"] * M, K)
        b_out = jnp.broadcast_to(b2.reshape(p["bb"][:nb - s] + (K, N)),
                                 outer + (K, N))
        if p["vpu"]:
            rhs2d = b_out.reshape(1, K)          # single broadcast row (VPU path)
        else:
            rhs2d = b_out.reshape(p["n_outer"] * K, N)
    else:
        a_out = jnp.broadcast_to(aa.reshape(p["ab"][:nb - s] + (M, K)),
                                 outer + (M, K))
        lhs2d = a_out.reshape(p["n_outer"] * M, K)
        b_full = jnp.broadcast_to(b2, outer + folded + (K, N))
        # outer + folded + (K, N)  ->  outer + (K,) + folded + (N,)
        b_full = jnp.moveaxis(b_full, len(outer) + s, len(outer))
        rhs2d = b_full.reshape(p["n_outer"] * K, p["n_fold"] * N)
    return lhs2d, rhs2d


def _postprocess(out2d, p):
    """Reshape one case's packed 2-D result back to torch.matmul's shape."""
    M, N = p["M"], p["N"]
    outer, folded = p["outer"], p["folded"]
    if p["fold"] == "M":
        out = out2d.reshape(p["o_batch"] + (M, N))
    else:
        out = out2d.reshape(outer + (M,) + folded + (N,))
        out = jnp.moveaxis(out, len(outer), len(outer) + len(folded))
    if p["a_1d"]:
        out = jnp.squeeze(out, axis=-2)
    if p["b_1d"]:
        out = jnp.squeeze(out, axis=-1)
    return out


def _pack_blocks(blocks):
    """Pad each (r, c) f32 block to (round_up(r, 8), 128) and stack along rows."""
    padded, offsets, row = [], [], 0
    for blk in blocks:
        r, c = blk.shape
        r8 = _round_up(max(r, 1), _SUBLANES)
        padded.append(jnp.pad(blk, ((0, r8 - r), (0, _LANES - c))))
        offsets.append(row)
        row += r8
    return jnp.concatenate(padded, axis=0), offsets, row


def _make_kernel(case_meta):
    """Single kernel body computing every case from / into the packed slabs."""

    def kernel(in_ref, out_ref):
        # Zero the lane-dense output slab once (covers inter-case padding).
        out_ref[...] = jnp.zeros(out_ref.shape, out_ref.dtype)
        for (lhs_off, rhs_off, out_off, n_dots, dm, k, dn, vpu) in case_meta:
            if vpu:
                # mat@vec / vec.vec: mul + row-reduce on VPU/XLU, no MXU pass.
                lhs = in_ref[lhs_off:lhs_off + dm, 0:k]
                row = in_ref[rhs_off:rhs_off + 1, 0:k]
                out_ref[out_off:out_off + dm, 0:1] = jnp.sum(
                    lhs * row, axis=-1, keepdims=True)
            else:
                for t in range(n_dots):          # statically unrolled (<= 4)
                    lhs = in_ref[lhs_off + t * dm:lhs_off + (t + 1) * dm, 0:k]
                    rhs = in_ref[rhs_off + t * k:rhs_off + (t + 1) * k, 0:dn]
                    out_ref[out_off + t * dm:out_off + (t + 1) * dm, 0:dn] = (
                        jnp.dot(lhs, rhs, preferred_element_type=jnp.float32))

    return kernel


def _model_forward_impl(*args):
    """Forward pass of Model: 16 torch.matmul's, fused into one pallas_call."""
    assert len(args) == 32
    plans, in_blocks = [], []
    for idx in range(16):
        a = args[2 * idx].astype(jnp.float32)
        b = args[2 * idx + 1].astype(jnp.float32)
        p = _plan_case(a.shape, b.shape)
        lhs2d, rhs2d = _prep_operands(a, b, p)
        plans.append(p)
        in_blocks += [lhs2d, rhs2d]

    in_slab, in_offsets, _ = _pack_blocks(in_blocks)

    case_meta, out_offsets, out_rows = [], [], 0
    for idx, p in enumerate(plans):
        rows = p["n_outer"] * p["dm"]
        out_offsets.append(out_rows)
        case_meta.append((in_offsets[2 * idx], in_offsets[2 * idx + 1],
                          out_rows, p["n_outer"], p["dm"], p["K"], p["dn"],
                          p["vpu"]))
        out_rows += _round_up(rows, _SUBLANES)

    out_slab = pl.pallas_call(
        _make_kernel(tuple(case_meta)),
        out_shape=jax.ShapeDtypeStruct((out_rows, _LANES), jnp.float32),
        in_specs=[pl.BlockSpec(memory_space=pltpu.MemorySpace.VMEM)],
        out_specs=pl.BlockSpec(memory_space=pltpu.MemorySpace.VMEM),
    )(in_slab)

    outs = []
    for idx, p in enumerate(plans):
        rows = p["n_outer"] * p["dm"]
        out2d = out_slab[out_offsets[idx]:out_offsets[idx] + rows, 0:p["dn"]]
        outs.append(_postprocess(out2d, p))
    return tuple(outs)


# Single jitted entry point: one executable, one dispatch from Python.
model_forward = jax.jit(_model_forward_impl)


if __name__ == "__main__":
    key = jax.random.PRNGKey(0)

    # 16 (lhs, rhs) shape pairs covering torch.matmul's broadcasting cases.
    shape_pairs = [
        ((8,), (8,)),                      # a: 1D @ 1D -> scalar
        ((6,), (6, 7)),                    # b: 1D @ 2D
        ((5,), (3, 5, 4)),                 # c: 1D @ 3D
        ((9, 6), (6,)),                    # d: 2D @ 1D
        ((2, 7, 5), (5,)),                 # e: 3D @ 1D
        ((4, 6), (6, 8)),                  # f: 2D @ 2D
        ((5, 4), (3, 4, 6)),               # g: 2D @ 3D (batch broadcast)
        ((2, 3, 5, 6), (6, 4)),            # h: 4D @ 2D
        ((3, 4, 5), (3, 5, 6)),            # i: 3D @ 3D
        ((2, 4, 5), (3, 1, 5, 6)),         # j: 3D @ 4D (broadcast)
        ((4, 1, 5, 6), (4, 3, 6, 7)),      # k: 4D @ 4D (broadcast)
        ((2, 2, 4, 5), (2, 2, 5, 6)),      # l: 4D @ 4D
        ((7,), (2, 3, 7, 4)),              # m: 1D @ 4D
        ((2, 3, 4, 5), (5,)),              # n: 4D @ 1D
        ((6, 5), (5, 6)),                  # o: 2D @ 2D
        ((1, 4, 8), (3, 8, 2)),            # p: 3D @ 3D (broadcast)
    ]

    inputs = []
    for sa, sb in shape_pairs:
        key, ka, kb = jax.random.split(key, 3)
        inputs.append(jax.random.normal(ka, sa, dtype=jnp.float32))
        inputs.append(jax.random.normal(kb, sb, dtype=jnp.float32))

    outs = jax.block_until_ready(model_forward(*inputs))

    for idx in range(16):
        a_np = np.asarray(inputs[2 * idx])
        b_np = np.asarray(inputs[2 * idx + 1])
        got = np.asarray(outs[idx])
        if b_np.ndim == 1:
            # VPU (exact f32) cases: compare against an exact float64 reference.
            ref = np.matmul(a_np.astype(np.float64), b_np.astype(np.float64))
        else:
            # MXU cases: compare against jnp.matmul (same default MXU precision).
            ref = np.asarray(jnp.matmul(inputs[2 * idx], inputs[2 * idx + 1]))
        assert got.shape == ref.shape, (idx, got.shape, ref.shape)
        np.testing.assert_allclose(got, ref, rtol=1e-4, atol=1e-4)

    print("KERNEL_OK")
</pallas_src>

<mosaic_0001>
module attributes {stable_mosaic.version = 11 : i64} {
  func.func @kernel(%arg0: memref<408x128xf32, #tpu.memory_space<vmem>>, %arg1: memref<232x128xf32, #tpu.memory_space<vmem>>) attributes {dimension_semantics = [], scalar_prefetch = 0 : i64, scratch_operands = 0 : i64, tpu.core_type = #tpu.core_type<tc>} {
    %cst = arith.constant 0.000000e+00 : f32
    %0 = vector.broadcast %cst : f32 to vector<232x128xf32>
    %c0 = arith.constant 0 : index
    %c0_0 = arith.constant 0 : index
    %1 = vector.load %arg1[%c0, %c0_0] : memref<232x128xf32, #tpu.memory_space<vmem>>, vector<232x128xf32>
    tpu.vector_store %arg1[%c0, %c0_0], %0 {strides = array<i32>} : memref<232x128xf32, #tpu.memory_space<vmem>>, vector<232x128xf32>,
    %c0_1 = arith.constant 0 : index
    %c0_2 = arith.constant 0 : index
    %2 = vector.load %arg0[%c0_1, %c0_2] : memref<408x128xf32, #tpu.memory_space<vmem>>, vector<1x8xf32>
    %c8 = arith.constant 8 : index
    %c0_3 = arith.constant 0 : index
    %3 = vector.load %arg0[%c8, %c0_3] : memref<408x128xf32, #tpu.memory_space<vmem>>, vector<1x8xf32>
    %4 = arith.mulf %2, %3 : vector<1x8xf32>
    %cst_4 = arith.constant dense<0.000000e+00> : vector<1xf32>
    %5 = vector.multi_reduction <add>, %4, %cst_4 [1] : vector<1x8xf32> to vector<1xf32>
    %6 = vector.shape_cast %5 : vector<1xf32> to vector<1x1xf32>
    %c0_5 = arith.constant 0 : index
    %c0_6 = arith.constant 0 : index
    %7 = vector.load %arg1[%c0_5, %c0_6] : memref<232x128xf32, #tpu.memory_space<vmem>>, vector<1x1xf32>
    tpu.vector_store %arg1[%c0_5, %c0_6], %6 {strides = array<i32>} : memref<232x128xf32, #tpu.memory_space<vmem>>, vector<1x1xf32>,
    %c16 = arith.constant 16 : index
    %c0_7 = arith.constant 0 : index
    %8 = vector.load %arg0[%c16, %c0_7] : memref<408x128xf32, #tpu.memory_space<vmem>>, vector<1x6xf32>
    %c24 = arith.constant 24 : index
    %c0_8 = arith.constant 0 : index
    %9 = vector.load %arg0[%c24, %c0_8] : memref<408x128xf32, #tpu.memory_space<vmem>>, vector<6x7xf32>
    %cst_9 = arith.constant dense<0.000000e+00> : vector<1x7xf32>
    %10 = tpu.matmul %8, %9, %cst_9 {dimension_numbers = #tpu.dot_dimension_numbers<[1], [0], [0], [1], [0, 0, 1, 1], [], []>} : vector<1x6xf32>, vector<6x7xf32>, vector<1x7xf32> -> vector<1x7xf32>
    %c8_10 = arith.constant 8 : index
    %c0_11 = arith.constant 0 : index
    %11 = vector.load %arg1[%c8_10, %c0_11] : memref<232x128xf32, #tpu.memory_space<vmem>>, vector<1x7xf32>
    tpu.vector_store %arg1[%c8_10, %c0_11], %10 {strides = array<i32>} : memref<232x128xf32, #tpu.memory_space<vmem>>, vector<1x7xf32>,
    %c32 = arith.constant 32 : index
    %c0_12 = arith.constant 0 : index
    %12 = vector.load %arg0[%c32, %c0_12] : memref<408x128xf32, #tpu.memory_space<vmem>>, vector<1x5xf32>
    %c40 = arith.constant 40 : index
    %c0_13 = arith.constant 0 : index
    %13 = vector.load %arg0[%c40, %c0_13] : memref<408x128xf32, #tpu.memory_space<vmem>>, vector<5x12xf32>
    %cst_14 = arith.constant dense<0.000000e+00> : vector<1x12xf32>
    %14 = tpu.matmul %12, %13, %cst_14 {dimension_numbers = #tpu.dot_dimension_numbers<[1], [0], [0], [1], [0, 0, 1, 1], [], []>} : vector<1x5xf32>, vector<5x12xf32>, vector<1x12xf32> -> vector<1x12xf32>
    %c16_15 = arith.constant 16 : index
    %c0_16 = arith.constant 0 : index
    %15 = vector.load %arg1[%c16_15, %c0_16] : memref<232x128xf32, #tpu.memory_space<vmem>>, vector<1x12xf32>
    tpu.vector_store %arg1[%c16_15, %c0_16], %14 {strides = array<i32>} : memref<232x128xf32, #tpu.memory_space<vmem>>, vector<1x12xf32>,
    %c48 = arith.constant 48 : index
    %c0_17 = arith.constant 0 : index
    %16 = vector.load %arg0[%c48, %c0_17] : memref<408x128xf32, #tpu.memory_space<vmem>>, vector<9x6xf32>
    %c64 = arith.constant 64 : index
    %c0_18 = arith.constant 0 : index
    %17 = vector.load %arg0[%c64, %c0_18] : memref<408x128xf32, #tpu.memory_space<vmem>>, vector<1x6xf32>
    %18 = vector.broadcast %17 : vector<1x6xf32> to vector<9x6xf32>
    %19 = arith.mulf %16, %18 : vector<9x6xf32>
    %cst_19 = arith.constant dense<0.000000e+00> : vector<9xf32>
    %20 = vector.multi_reduction <add>, %19, %cst_19 [1] : vector<9x6xf32> to vector<9xf32>
    %21 = vector.shape_cast %20 : vector<9xf32> to vector<9x1xf32>
    %c24_20 = arith.constant 24 : index
    %c0_21 = arith.constant 0 : index
    %22 = vector.load %arg1[%c24_20, %c0_21] : memref<232x128xf32, #tpu.memory_space<vmem>>, vector<9x1xf32>
    tpu.vector_store %arg1[%c24_20, %c0_21], %21 {strides = array<i32>} : memref<232x128xf32, #tpu.memory_space<vmem>>, vector<9x1xf32>,
    %c72 = arith.constant 72 : index
    %c0_22 = arith.constant 0 : index
    %23 = vector.load %arg0[%c72, %c0_22] : memref<408x128xf32, #tpu.memory_space<vmem>>, vector<14x5xf32>
    %c88 = arith.constant 88 : index
    %c0_23 = arith.constant 0 : index
    %24 = vector.load %arg0[%c88, %c0_23] : memref<408x128xf32, #tpu.memory_space<vmem>>, vector<1x5xf32>
    %25 = vector.broadcast %24 : vector<1x5xf32> to vector<14x5xf32>
    %26 = arith.mulf %23, %25 : vector<14x5xf32>
    %cst_24 = arith.constant dense<0.000000e+00> : vector<14xf32>
    %27 = vector.multi_reduction <add>, %26, %cst_24 [1] : vector<14x5xf32> to vector<14xf32>
    %28 = vector.shape_cast %27 : vector<14xf32> to vector<14x1xf32>
    %c40_25 = arith.constant 40 : index
    %c0_26 = arith.constant 0 : index
    %29 = vector.load %arg1[%c40_25, %c0_26] : memref<232x128xf32, #tpu.memory_space<vmem>>, vector<14x1xf32>
    tpu.vector_store %arg1[%c40_25, %c0_26], %28 {strides = array<i32>} : memref<232x128xf32, #tpu.memory_space<vmem>>, vector<14x1xf32>,
    %c96 = arith.constant 96 : index
    %c0_27 = arith.constant 0 : index
    %30 = vector.load %arg0[%c96, %c0_27] : memref<408x128xf32, #tpu.memory_space<vmem>>, vector<4x6xf32>
    %c104 = arith.constant 104 : index
    %c0_28 = arith.constant 0 : index
    %31 = vector.load %arg0[%c104, %c0_28] : memref<408x128xf32, #tpu.memory_space<vmem>>, vector<6x8xf32>
    %cst_29 = arith.constant dense<0.000000e+00> : vector<4x8xf32>
    %32 = tpu.matmul %30, %31, %cst_29 {dimension_numbers = #tpu.dot_dimension_numbers<[1], [0], [0], [1], [0, 0, 1, 1], [], []>} : vector<4x6xf32>, vector<6x8xf32>, vector<4x8xf32> -> vector<4x8xf32>
    %c56 = arith.constant 56 : index
    %c0_30 = arith.constant 0 : index
    %33 = vector.load %arg1[%c56, %c0_30] : memref<232x128xf32, #tpu.memory_space<vmem>>, vector<4x8xf32>
    tpu.vector_store %arg1[%c56, %c0_30], %32 {strides = array<i32>} : memref<232x128xf32, #tpu.memory_space<vmem>>, vector<4x8xf32>,
    %c112 = arith.constant 112 : index
    %c0_31 = arith.constant 0 : index
    %34 = vector.load %arg0[%c112, %c0_31] : memref<408x128xf32, #tpu.memory_space<vmem>>, vector<5x4xf32>
    %c120 = arith.constant 120 : index
    %c0_32 = arith.constant 0 : index
    %35 = vector.load %arg0[%c120, %c0_32] : memref<408x128xf32, #tpu.memory_space<vmem>>, vector<4x18xf32>
    %cst_33 = arith.constant dense<0.000000e+00> : vector<5x18xf32>
    %36 = tpu.matmul %34, %35, %cst_33 {dimension_numbers = #tpu.dot_dimension_numbers<[1], [0], [0], [1], [0, 0, 1, 1], [], []>} : vector<5x4xf32>, vector<4x18xf32>, vector<5x18xf32> -> vector<5x18xf32>
    %c64_34 = arith.constant 64 : index
    %c0_35 = arith.constant 0 : index
    %37 = vector.load %arg1[%c64_34, %c0_35] : memref<232x128xf32, #tpu.memory_space<vmem>>, vector<5x18xf32>
    tpu.vector_store %arg1[%c64_34, %c0_35], %36 {strides = array<i32>} : memref<232x128xf32, #tpu.memory_space<vmem>>, vector<5x18xf32>,
    %c128 = arith.constant 128 : index
    %c0_36 = arith.constant 0 : index
    %38 = vector.load %arg0[%c128, %c0_36] : memref<408x128xf32, #tpu.memory_space<vmem>>, vector<30x6xf32>
    %c160 = arith.constant 160 : index
    %c0_37 = arith.constant 0 : index
    %39 = vector.load %arg0[%c160, %c0_37] : memref<408x128xf32, #tpu.memory_space<vmem>>, vector<6x4xf32>
    %cst_38 = arith.constant dense<0.000000e+00> : vector<30x4xf32>
    %40 = tpu.matmul %38, %39, %cst_38 {dimension_numbers = #tpu.dot_dimension_numbers<[1], [0], [0], [1], [0, 0, 1, 1], [], []>} : vector<30x6xf32>, vector<6x4xf32>, vector<30x4xf32> -> vector<30x4xf32>
    %c72_39 = arith.constant 72 : index
    %c0_40 = arith.constant 0 : index
    %41 = vector.load %arg1[%c72_39, %c0_40] : memref<232x128xf32, #tpu.memory_space<vmem>>, vector<30x4xf32>
    tpu.vector_store %arg1[%c72_39, %c0_40], %40 {strides = array<i32>} : memref<232x128xf32, #tpu.memory_space<vmem>>, vector<30x4xf32>,
    %c168 = arith.constant 168 : index
    %c0_41 = arith.constant 0 : index
    %42 = vector.load %arg0[%c168, %c0_41] : memref<408x128xf32, #tpu.memory_space<vmem>>, vector<4x5xf32>
    %c184 = arith.constant 184 : index
    %c0_42 = arith.constant 0 : index
    %43 = vector.load %arg0[%c184, %c0_42] : memref<408x128xf32, #tpu.memory_space<vmem>>, vector<5x6xf32>
    %cst_43 = arith.constant dense<0.000000e+00> : vector<4x6xf32>
    %44 = tpu.matmul %42, %43, %cst_43 {dimension_numbers = #tpu.dot_dimension_numbers<[1], [0], [0], [1], [0, 0, 1, 1], [], []>} : vector<4x5xf32>, vector<5x6xf32>, vector<4x6xf32> -> vector<4x6xf32>
    %c104_44 = arith.constant 104 : index
    %c0_45 = arith.constant 0 : index
    %45 = vector.load %arg1[%c104_44, %c0_45] : memref<232x128xf32, #tpu.memory_space<vmem>>, vector<4x6xf32>
    tpu.vector_store %arg1[%c104_44, %c0_45], %44 {strides = array<i32>} : memref<232x128xf32, #tpu.memory_space<vmem>>, vector<4x6xf32>,
    %c172 = arith.constant 172 : index
    %c0_46 = arith.constant 0 : index
    %46 = vector.load %arg0[%c172, %c0_46] : memref<408x128xf32, #tpu.memory_space<vmem>>, vector<4x5xf32>
    %c189 = arith.constant 189 : index
    %c0_47 = arith.constant 0 : index
    %47 = vector.load %arg0[%c189, %c0_47] : memref<408x128xf32, #tpu.memory_space<vmem>>, vector<5x6xf32>
    %cst_48 = arith.constant dense<0.000000e+00> : vector<4x6xf32>
    %48 = tpu.matmul %46, %47, %cst_48 {dimension_numbers = #tpu.dot_dimension_numbers<[1], [0], [0], [1], [0, 0, 1, 1], [], []>} : vector<4x5xf32>, vector<5x6xf32>, vector<4x6xf32> -> vector<4x6xf32>
    %c108 = arith.constant 108 : index
    %c0_49 = arith.constant 0 : index
    %49 = vector.load %arg1[%c108, %c0_49] : memref<232x128xf32, #tpu.memory_space<vmem>>, vector<4x6xf32>
    tpu.vector_store %arg1[%c108, %c0_49], %48 {strides = array<i32>} : memref<232x128xf32, #tpu.memory_space<vmem>>, vector<4x6xf32>,
    %c176 = arith.constant 176 : index
    %c0_50 = arith.constant 0 : index
    %50 = vector.load %arg0[%c176, %c0_50] : memref<408x128xf32, #tpu.memory_space<vmem>>, vector<4x5xf32>
    %c194 = arith.constant 194 : index
    %c0_51 = arith.constant 0 : index
    %51 = vector.load %arg0[%c194, %c0_51] : memref<408x128xf32, #tpu.memory_space<vmem>>, vector<5x6xf32>
    %cst_52 = arith.constant dense<0.000000e+00> : vector<4x6xf32>
    %52 = tpu.matmul %50, %51, %cst_52 {dimension_numbers = #tpu.dot_dimension_numbers<[1], [0], [0], [1], [0, 0, 1, 1], [], []>} : vector<4x5xf32>, vector<5x6xf32>, vector<4x6xf32> -> vector<4x6xf32>
    %c112_53 = arith.constant 112 : index
    %c0_54 = arith.constant 0 : index
    %53 = vector.load %arg1[%c112_53, %c0_54] : memref<232x128xf32, #tpu.memory_space<vmem>>, vector<4x6xf32>
    tpu.vector_store %arg1[%c112_53, %c0_54], %52 {strides = array<i32>} : memref<232x128xf32, #tpu.memory_space<vmem>>, vector<4x6xf32>,
    %c200 = arith.constant 200 : index
    %c0_55 = arith.constant 0 : index
    %54 = vector.load %arg0[%c200, %c0_55] : memref<408x128xf32, #tpu.memory_space<vmem>>, vector<8x5xf32>
    %c224 = arith.constant 224 : index
    %c0_56 = arith.constant 0 : index
    %55 = vector.load %arg0[%c224, %c0_56] : memref<408x128xf32, #tpu.memory_space<vmem>>, vector<5x6xf32>
    %cst_57 = arith.constant dense<0.000000e+00> : vector<8x6xf32>
    %56 = tpu.matmul %54, %55, %cst_57 {dimension_numbers = #tpu.dot_dimension_numbers<[1], [0], [0], [1], [0, 0, 1, 1], [], []>} : vector<8x5xf32>, vector<5x6xf32>, vector<8x6xf32> -> vector<8x6xf32>
    %c120_58 = arith.constant 120 : index
    %c0_59 = arith.constant 0 : index
    %57 = vector.load %arg1[%c120_58, %c0_59] : memref<232x128xf32, #tpu.memory_space<vmem>>, vector<8x6xf32>
    tpu.vector_store %arg1[%c120_58, %c0_59], %56 {strides = array<i32>} : memref<232x128xf32, #tpu.memory_space<vmem>>, vector<8x6xf32>,
    %c208 = arith.constant 208 : index
    %c0_60 = arith.constant 0 : index
    %58 = vector.load %arg0[%c208, %c0_60] : memref<408x128xf32, #tpu.memory_space<vmem>>, vector<8x5xf32>
    %c229 = arith.constant 229 : index
    %c0_61 = arith.constant 0 : index
    %59 = vector.load %arg0[%c229, %c0_61] : memref<408x128xf32, #tpu.memory_space<vmem>>, vector<5x6xf32>
    %cst_62 = arith.constant dense<0.000000e+00> : vector<8x6xf32>
    %60 = tpu.matmul %58, %59, %cst_62 {dimension_numbers = #tpu.dot_dimension_numbers<[1], [0], [0], [1], [0, 0, 1, 1], [], []>} : vector<8x5xf32>, vector<5x6xf32>, vector<8x6xf32> -> vector<8x6xf32>
    %c128_63 = arith.constant 128 : index
    %c0_64 = arith.constant 0 : index
    %61 = vector.load %arg1[%c128_63, %c0_64] : memref<232x128xf32, #tpu.memory_space<vmem>>, vector<8x6xf32>
    tpu.vector_store %arg1[%c128_63, %c0_64], %60 {strides = array<i32>} : memref<232x128xf32, #tpu.memory_space<vmem>>, vector<8x6xf32>,
    %c216 = arith.constant 216 : index
    %c0_65 = arith.constant 0 : index
    %62 = vector.load %arg0[%c216, %c0_65] : memref<408x128xf32, #tpu.memory_space<vmem>>, vector<8x5xf32>
    %c234 = arith.constant 234 : index
    %c0_66 = arith.constant 0 : index
    %63 = vector.load %arg0[%c234, %c0_66] : memref<408x128xf32, #tpu.memory_space<vmem>>, vector<5x6xf32>
    %cst_67 = arith.constant dense<0.000000e+00> : vector<8x6xf32>
    %64 = tpu.matmul %62, %63, %cst_67 {dimension_numbers = #tpu.dot_dimension_numbers<[1], [0], [0], [1], [0, 0, 1, 1], [], []>} : vector<8x5xf32>, vector<5x6xf32>, vector<8x6xf32> -> vector<8x6xf32>
    %c136 = arith.constant 136 : index
    %c0_68 = arith.constant 0 : index
    %65 = vector.load %arg1[%c136, %c0_68] : memref<232x128xf32, #tpu.memory_space<vmem>>, vector<8x6xf32>
    tpu.vector_store %arg1[%c136, %c0_68], %64 {strides = array<i32>} : memref<232x128xf32, #tpu.memory_space<vmem>>, vector<8x6xf32>,
    %c240 = arith.constant 240 : index
    %c0_69 = arith.constant 0 : index
    %66 = vector.load %arg0[%c240, %c0_69] : memref<408x128xf32, #tpu.memory_space<vmem>>, vector<5x6xf32>
    %c264 = arith.constant 264 : index
    %c0_70 = arith.constant 0 : index
    %67 = vector.load %arg0[%c264, %c0_70] : memref<408x128xf32, #tpu.memory_space<vmem>>, vector<6x21xf32>
    %cst_71 = arith.constant dense<0.000000e+00> : vector<5x21xf32>
    %68 = tpu.matmul %66, %67, %cst_71 {dimension_numbers = #tpu.dot_dimension_numbers<[1], [0], [0], [1], [0, 0, 1, 1], [], []>} : vector<5x6xf32>, vector<6x21xf32>, vector<5x21xf32> -> vector<5x21xf32>
    %c144 = arith.constant 144 : index
    %c0_72 = arith.constant 0 : index
    %69 = vector.load %arg1[%c144, %c0_72] : memref<232x128xf32, #tpu.memory_space<vmem>>, vector<5x21xf32>
    tpu.vector_store %arg1[%c144, %c0_72], %68 {strides = array<i32>} : memref<232x128xf32, #tpu.memory_space<vmem>>, vector<5x21xf32>,
    %c245 = arith.constant 245 : index
    %c0_73 = arith.constant 0 : index
    %70 = vector.load %arg0[%c245, %c0_73] : memref<408x128xf32, #tpu.memory_space<vmem>>, vector<5x6xf32>
    %c270 = arith.constant 270 : index
    %c0_74 = arith.constant 0 : index
    %71 = vector.load %arg0[%c270, %c0_74] : memref<408x128xf32, #tpu.memory_space<vmem>>, vector<6x21xf32>
    %cst_75 = arith.constant dense<0.000000e+00> : vector<5x21xf32>
    %72 = tpu.matmul %70, %71, %cst_75 {dimension_numbers = #tpu.dot_dimension_numbers<[1], [0], [0], [1], [0, 0, 1, 1], [], []>} : vector<5x6xf32>, vector<6x21xf32>, vector<5x21xf32> -> vector<5x21xf32>
    %c149 = arith.constant 149 : index
    %c0_76 = arith.constant 0 : index
    %73 = vector.load %arg1[%c149, %c0_76] : memref<232x128xf32, #tpu.memory_space<vmem>>, vector<5x21xf32>
    tpu.vector_store %arg1[%c149, %c0_76], %72 {strides = array<i32>} : memref<232x128xf32, #tpu.memory_space<vmem>>, vector<5x21xf32>,
    %c250 = arith.constant 250 : index
    %c0_77 = arith.constant 0 : index
    %74 = vector.load %arg0[%c250, %c0_77] : memref<408x128xf32, #tpu.memory_space<vmem>>, vector<5x6xf32>
    %c276 = arith.constant 276 : index
    %c0_78 = arith.constant 0 : index
    %75 = vector.load %arg0[%c276, %c0_78] : memref<408x128xf32, #tpu.memory_space<vmem>>, vector<6x21xf32>
    %cst_79 = arith.constant dense<0.000000e+00> : vector<5x21xf32>
    %76 = tpu.matmul %74, %75, %cst_79 {dimension_numbers = #tpu.dot_dimension_numbers<[1], [0], [0], [1], [0, 0, 1, 1], [], []>} : vector<5x6xf32>, vector<6x21xf32>, vector<5x21xf32> -> vector<5x21xf32>
    %c154 = arith.constant 154 : index
    %c0_80 = arith.constant 0 : index
    %77 = vector.load %arg1[%c154, %c0_80] : memref<232x128xf32, #tpu.memory_space<vmem>>, vector<5x21xf32>
    tpu.vector_store %arg1[%c154, %c0_80], %76 {strides = array<i32>} : memref<232x128xf32, #tpu.memory_space<vmem>>, vector<5x21xf32>,
    %c255 = arith.constant 255 : index
    %c0_81 = arith.constant 0 : index
    %78 = vector.load %arg0[%c255, %c0_81] : memref<408x128xf32, #tpu.memory_space<vmem>>, vector<5x6xf32>
    %c282 = arith.constant 282 : index
    %c0_82 = arith.constant 0 : index
    %79 = vector.load %arg0[%c282, %c0_82] : memref<408x128xf32, #tpu.memory_space<vmem>>, vector<6x21xf32>
    %cst_83 = arith.constant dense<0.000000e+00> : vector<5x21xf32>
    %80 = tpu.matmul %78, %79, %cst_83 {dimension_numbers = #tpu.dot_dimension_numbers<[1], [0], [0], [1], [0, 0, 1, 1], [], []>} : vector<5x6xf32>, vector<6x21xf32>, vector<5x21xf32> -> vector<5x21xf32>
    %c159 = arith.constant 159 : index
    %c0_84 = arith.constant 0 : index
    %81 = vector.load %arg1[%c159, %c0_84] : memref<232x128xf32, #tpu.memory_space<vmem>>, vector<5x21xf32>
    tpu.vector_store %arg1[%c159, %c0_84], %80 {strides = array<i32>} : memref<232x128xf32, #tpu.memory_space<vmem>>, vector<5x21xf32>,
    %c288 = arith.constant 288 : index
    %c0_85 = arith.constant 0 : index
    %82 = vector.load %arg0[%c288, %c0_85] : memref<408x128xf32, #tpu.memory_space<vmem>>, vector<4x5xf32>
    %c304 = arith.constant 304 : index
    %c0_86 = arith.constant 0 : index
    %83 = vector.load %arg0[%c304, %c0_86] : memref<408x128xf32, #tpu.memory_space<vmem>>, vector<5x6xf32>
    %cst_87 = arith.constant dense<0.000000e+00> : vector<4x6xf32>
    %84 = tpu.matmul %82, %83, %cst_87 {dimension_numbers = #tpu.dot_dimension_numbers<[1], [0], [0], [1], [0, 0, 1, 1], [], []>} : vector<4x5xf32>, vector<5x6xf32>, vector<4x6xf32> -> vector<4x6xf32>
    %c168_88 = arith.constant 168 : index
    %c0_89 = arith.constant 0 : index
    %85 = vector.load %arg1[%c168_88, %c0_89] : memref<232x128xf32, #tpu.memory_space<vmem>>, vector<4x6xf32>
    tpu.vector_store %arg1[%c168_88, %c0_89], %84 {strides = array<i32>} : memref<232x128xf32, #tpu.memory_space<vmem>>, vector<4x6xf32>,
    %c292 = arith.constant 292 : index
    %c0_90 = arith.constant 0 : index
    %86 = vector.load %arg0[%c292, %c0_90] : memref<408x128xf32, #tpu.memory_space<vmem>>, vector<4x5xf32>
    %c309 = arith.constant 309 : index
    %c0_91 = arith.constant 0 : index
    %87 = vector.load %arg0[%c309, %c0_91] : memref<408x128xf32, #tpu.memory_space<vmem>>, vector<5x6xf32>
    %cst_92 = arith.constant dense<0.000000e+00> : vector<4x6xf32>
    %88 = tpu.matmul %86, %87, %cst_92 {dimension_numbers = #tpu.dot_dimension_numbers<[1], [0], [0], [1], [0, 0, 1, 1], [], []>} : vector<4x5xf32>, vector<5x6xf32>, vector<4x6xf32> -> vector<4x6xf32>
    %c172_93 = arith.constant 172 : index
    %c0_94 = arith.constant 0 : index
    %89 = vector.load %arg1[%c172_93, %c0_94] : memref<232x128xf32, #tpu.memory_space<vmem>>, vector<4x6xf32>
    tpu.vector_store %arg1[%c172_93, %c0_94], %88 {strides = array<i32>} : memref<232x128xf32, #tpu.memory_space<vmem>>, vector<4x6xf32>,
    %c296 = arith.constant 296 : index
    %c0_95 = arith.constant 0 : index
    %90 = vector.load %arg0[%c296, %c0_95] : memref<408x128xf32, #tpu.memory_space<vmem>>, vector<4x5xf32>
    %c314 = arith.constant 314 : index
    %c0_96 = arith.constant 0 : index
    %91 = vector.load %arg0[%c314, %c0_96] : memref<408x128xf32, #tpu.memory_space<vmem>>, vector<5x6xf32>
    %cst_97 = arith.constant dense<0.000000e+00> : vector<4x6xf32>
    %92 = tpu.matmul %90, %91, %cst_97 {dimension_numbers = #tpu.dot_dimension_numbers<[1], [0], [0], [1], [0, 0, 1, 1], [], []>} : vector<4x5xf32>, vector<5x6xf32>, vector<4x6xf32> -> vector<4x6xf32>
    %c176_98 = arith.constant 176 : index
    %c0_99 = arith.constant 0 : index
    %93 = vector.load %arg1[%c176_98, %c0_99] : memref<232x128xf32, #tpu.memory_space<vmem>>, vector<4x6xf32>
    tpu.vector_store %arg1[%c176_98, %c0_99], %92 {strides = array<i32>} : memref<232x128xf32, #tpu.memory_space<vmem>>, vector<4x6xf32>,
    %c300 = arith.constant 300 : index
    %c0_100 = arith.constant 0 : index
    %94 = vector.load %arg0[%c300, %c0_100] : memref<408x128xf32, #tpu.memory_space<vmem>>, vector<4x5xf32>
    %c319 = arith.constant 319 : index
    %c0_101 = arith.constant 0 : index
    %95 = vector.load %arg0[%c319, %c0_101] : memref<408x128xf32, #tpu.memory_space<vmem>>, vector<5x6xf32>
    %cst_102 = arith.constant dense<0.000000e+00> : vector<4x6xf32>
    %96 = tpu.matmul %94, %95, %cst_102 {dimension_numbers = #tpu.dot_dimension_numbers<[1], [0], [0], [1], [0, 0, 1, 1], [], []>} : vector<4x5xf32>, vector<5x6xf32>, vector<4x6xf32> -> vector<4x6xf32>
    %c180 = arith.constant 180 : index
    %c0_103 = arith.constant 0 : index
    %97 = vector.load %arg1[%c180, %c0_103] : memref<232x128xf32, #tpu.memory_space<vmem>>, vector<4x6xf32>
    tpu.vector_store %arg1[%c180, %c0_103], %96 {strides = array<i32>} : memref<232x128xf32, #tpu.memory_space<vmem>>, vector<4x6xf32>,
    %c328 = arith.constant 328 : index
    %c0_104 = arith.constant 0 : index
    %98 = vector.load %arg0[%c328, %c0_104] : memref<408x128xf32, #tpu.memory_space<vmem>>, vector<1x7xf32>
    %c336 = arith.constant 336 : index
    %c0_105 = arith.constant 0 : index
    %99 = vector.load %arg0[%c336, %c0_105] : memref<408x128xf32, #tpu.memory_space<vmem>>, vector<7x24xf32>
    %cst_106 = arith.constant dense<0.000000e+00> : vector<1x24xf32>
    %100 = tpu.matmul %98, %99, %cst_106 {dimension_numbers = #tpu.dot_dimension_numbers<[1], [0], [0], [1], [0, 0, 1, 1], [], []>} : vector<1x7xf32>, vector<7x24xf32>, vector<1x24xf32> -> vector<1x24xf32>
    %c184_107 = arith.constant 184 : index
    %c0_108 = arith.constant 0 : index
    %101 = vector.load %arg1[%c184_107, %c0_108] : memref<232x128xf32, #tpu.memory_space<vmem>>, vector<1x24xf32>
    tpu.vector_store %arg1[%c184_107, %c0_108], %100 {strides = array<i32>} : memref<232x128xf32, #tpu.memory_space<vmem>>, vector<1x24xf32>,
    %c344 = arith.constant 344 : index
    %c0_109 = arith.constant 0 : index
    %102 = vector.load %arg0[%c344, %c0_109] : memref<408x128xf32, #tpu.memory_space<vmem>>, vector<24x5xf32>
    %c368 = arith.constant 368 : index
    %c0_110 = arith.constant 0 : index
    %103 = vector.load %arg0[%c368, %c0_110] : memref<408x128xf32, #tpu.memory_space<vmem>>, vector<1x5xf32>
    %104 = vector.broadcast %103 : vector<1x5xf32> to vector<24x5xf32>
    %105 = arith.mulf %102, %104 : vector<24x5xf32>
    %cst_111 = arith.constant dense<0.000000e+00> : vector<24xf32>
    %106 = vector.multi_reduction <add>, %105, %cst_111 [1] : vector<24x5xf32> to vector<24xf32>
    %107 = vector.shape_cast %106 : vector<24xf32> to vector<24x1xf32>
    %c192 = arith.constant 192 : index
    %c0_112 = arith.constant 0 : index
    %108 = vector.load %arg1[%c192, %c0_112] : memref<232x128xf32, #tpu.memory_space<vmem>>, vector<24x1xf32>
    tpu.vector_store %arg1[%c192, %c0_112], %107 {strides = array<i32>} : memref<232x128xf32, #tpu.memory_space<vmem>>, vector<24x1xf32>,
    %c376 = arith.constant 376 : index
    %c0_113 = arith.constant 0 : index
    %109 = vector.load %arg0[%c376, %c0_113] : memref<408x128xf32, #tpu.memory_space<vmem>>, vector<6x5xf32>
    %c384 = arith.constant 384 : index
    %c0_114 = arith.constant 0 : index
    %110 = vector.load %arg0[%c384, %c0_114] : memref<408x128xf32, #tpu.memory_space<vmem>>, vector<5x6xf32>
    %cst_115 = arith.constant dense<0.000000e+00> : vector<6x6xf32>
    %111 = tpu.matmul %109, %110, %cst_115 {dimension_numbers = #tpu.dot_dimension_numbers<[1], [0], [0], [1], [0, 0, 1, 1], [], []>} : vector<6x5xf32>, vector<5x6xf32>, vector<6x6xf32> -> vector<6x6xf32>
    %c216_116 = arith.constant 216 : index
    %c0_117 = arith.constant 0 : index
    %112 = vector.load %arg1[%c216_116, %c0_117] : memref<232x128xf32, #tpu.memory_space<vmem>>, vector<6x6xf32>
    tpu.vector_store %arg1[%c216_116, %c0_117], %111 {strides = array<i32>} : memref<232x128xf32, #tpu.memory_space<vmem>>, vector<6x6xf32>,
    %c392 = arith.constant 392 : index
    %c0_118 = arith.constant 0 : index
    %113 = vector.load %arg0[%c392, %c0_118] : memref<408x128xf32, #tpu.memory_space<vmem>>, vector<4x8xf32>
    %c400 = arith.constant 400 : index
    %c0_119 = arith.constant 0 : index
    %114 = vector.load %arg0[%c400, %c0_119] : memref<408x128xf32, #tpu.memory_space<vmem>>, vector<8x6xf32>
    %cst_120 = arith.constant dense<0.000000e+00> : vector<4x6xf32>
    %115 = tpu.matmul %113, %114, %cst_120 {dimension_numbers = #tpu.dot_dimension_numbers<[1], [0], [0], [1], [0, 0, 1, 1], [], []>} : vector<4x8xf32>, vector<8x6xf32>, vector<4x6xf32> -> vector<4x6xf32>
    %c224_121 = arith.constant 224 : index
    %c0_122 = arith.constant 0 : index
    %116 = vector.load %arg1[%c224_121, %c0_122] : memref<232x128xf32, #tpu.memory_space<vmem>>, vector<4x6xf32>
    tpu.vector_store %arg1[%c224_121, %c0_122], %115 {strides = array<i32>} : memref<232x128xf32, #tpu.memory_space<vmem>>, vector<4x6xf32>,
    return
  }
}

</mosaic_0001>

<bundles_post_ra>
// kernel: _model_forward_impl.1
= control target key start
LH: loop header
LB: loop body
LE: loop exit
PB: predicated region body
PF: predicated region fallthrough
CT: control target
= control target key end

     0   :  { %vm52_vm0 = vcmask 1045504   ;;  %vm48_vm1 = vcmask 48128   ;;  %vm178_vm2 = vcmask 1043456   ;;  %vm174_vm3 = vcmask 31744   ;;  %s1299_s0 = inlined_call_operand.vmem [shape: f32[408,128], index: 0, kind: input, shape index: {}]   ;;  %s1300_s1 = inlined_call_operand.vmem [shape: f32[232,128], index: 1, kind: output, shape index: {}]  }
   0x1   :  { %v47_v0 = vld [vmem:[%s1299_s0 + $0x18] sm:$0x3f]  ;;  %v46_v1 = vld [vmem:[%s1299_s0 + $0x10] sm:$0x1]  ;;  %v208_v2 = vld [vmem:[%s1299_s0 + $0xa0] sm:$0x3f] }
   0x2   :  { %779 = vmatpush.msk.msra.mxu0 %vm52_vm0, %v47_v0  ;;  %v143_v3 = vld [vmem:[%s1299_s0 + $0x68] sm:$0x3f]  ;;  %v173_v4 = vld [vmem:[%s1299_s0 + $0x78] sm:$0xf]  ;;  %v142_v5 = vld [vmem:[%s1299_s0 + $0x60] sm:$0xf] }
   0x3   :  { %780 = vmatmul.msk.f32.vlgmr.msra.gmra.mxu0 %vm48_vm1, %v46_v1  ;;  %783 = vmatpush.msk.msra.mxu2 %vm52_vm0, %v143_v3  ;;  %v172_v6 = vld [vmem:[%s1299_s0 + $0x70] sm:$0x1f]  ;;  %v289_v7 = vld [vmem:[%s1299_s0 + $0xbd] sm:$0x1f]  ;;  %vm84_vm4 = vcmask 1044480   ;;  %vm80_vm5 = vcmask 39936  }
   0x4   :  { %787 = vmatpush.msk.msrb.mxu0 %vm52_vm0, %v208_v2  ;;  %785 = vmatpush.msk.msra.mxu3 %vm178_vm2, %v173_v4  ;;  %v318_v8 = vld [vmem:[%s1299_s0 + $0xc2] sm:$0x1f]  ;;  %v79_v9 = vld [vmem:[%s1299_s0 + $0x28] sm:$0x1f]  ;;  %v78_v10 = vld [vmem:[%s1299_s0 + $0x20] sm:$0x1] }
   0x5   :  { %784 = vmatmul.msk.f32.vlgmr.msra.gmra.mxu2 %vm48_vm1, %v142_v5  ;;  %786 = vmatmul.msk.f32.vlgmr.msra.gmra.mxu3 %vm174_vm3, %v172_v6  ;;  %v609_v11 = vld [vmem:[%s1299_s0 + $0x13a] sm:$0x1f]  ;;  %v376_v13 = vld [vmem:[%s1299_s0 + $0xe5] sm:$0x1f]  ;;  %v405_v14 = vld [vmem:[%s1299_s0 + $0xea] sm:$0x1f] }
   0x6   :  { %794 = vmatpush.msk.msrb.mxu2 %vm84_vm4, %v289_v7  ;;  %796 = vmatpush.msk.msrb.mxu3 %vm84_vm4, %v318_v8  ;;  %v259_v12 = vld [vmem:[%s1299_s0 + $0xb8] sm:$0x1f]  ;;  %v204_v15 = vld [vmem:[%s1299_s0 + $0x80] sm:$0xff]  ;;  %v288_v17 = vld [vmem:[%s1299_s0 + $0xac] sm:$0xf]  ;;  %vm119_vm6 = vcmask 40960  }
   0x7   :  { %781 = vmatpush.msk.msra.mxu1 %vm84_vm4, %v79_v9  ;;  %816 = vmatpush.msk.msra.mxu0 %vm84_vm4, %v609_v11  ;;  %v347_v16 = vld [vmem:[%s1299_s0 + $0xe0] sm:$0x1f]  ;;  %v317_v18 = vld [vmem:[%s1299_s0 + $0xb0] sm:$0xf]  ;;  %v493_v20 = vld [vmem:[%s1299_s0 + $0x114] sm:$0x3f] }
   0x8   :  { %782 = vmatmul.msk.f32.vlgmr.msra.gmra.mxu1 %vm80_vm5, %v78_v10  ;;  %800 = vmatpush.msk.msra.mxu2 %vm84_vm4, %v376_v13  ;;  %v464_v19 = vld [vmem:[%s1299_s0 + $0x10e] sm:$0x3f]  ;;  %v258_v21 = vld [vmem:[%s1299_s0 + $0xa8] sm:$0xf]  ;;  %v111_v26 = vld [vmem:[%s1299_s0 + $0x38] sm:$0x1] }
   0x9   :  { %792 = vmatpush.msk.msrb.mxu1 %vm84_vm4, %v259_v12  ;;  %802 = vmatpush.msk.msra.mxu3 %vm84_vm4, %v405_v14  ;;  %v434_v22 = vld [vmem:[%s1299_s0 + $0x108] sm:$0x3f]  ;;  %v749_v24 = vld [vmem:[%s1299_s0 + $0x190] sm:$0xff]  ;;  %v404_v27 = vld [vmem:[%s1299_s0 + $0xd8] sm:$0xff]  ;;  %vm40_vm7 = vcmask 57344   ;;  %vm135_vm8 = vcmask 37888  }
   0xa   :  { %v205_v23 = vld [vmem:[%s1299_s0 + $0x88] sm:$0xff]  ;;  %v375_v25 = vld [vmem:[%s1299_s0 + $0xd0] sm:$0xff]  ;;  %v826_v28 = vld [vmem:[%s1299_s0 + $0x40] ss:$0 sm:$0xff]  ;;  %v829_v42 = vmov 0.0   ;;  %vm672_vm9 = vcmask 1046528  }
   0xb   :  { %798 = vmatpush.msk.msra.mxu1 %vm84_vm4, %v347_v16  ;;  %788 = vmatmul.msk.f32.vlgmr.msrb.gmra.mxu0 %vm48_vm1, %v204_v15  ;;  %v37_v29 = vld [vmem:[%s1299_s0] sm:$0x1]  ;;  %v551_v30 = vld [vmem:[%s1299_s0 + $0x130] sm:$0x1f]  ;;  %v38_v31 = vld [vmem:[%s1299_s0 + $0x8] sm:$0x1]  ;;  %v115_v33 = vmul.f32 %v826_v28, %v111_v26  ;;  %8 = vst [vmem:[%s1300_s1] sm:$0xff] %v829_v42 }
   0xc   :  { %769 = vmatpush.msrb.mxu0 %v749_v24  ;;  %v580_v32 = vld [vmem:[%s1299_s0 + $0x135] sm:$0x1f]  ;;  %v39_v34 = vmul.f32 %v38_v31, %v37_v29  ;;  %v346_v36 = vld [vmem:[%s1299_s0 + $0xc8] sm:$0xff]  ;;  %v522_v43 = vld [vmem:[%s1299_s0 + $0x11a] sm:$0x3f]  ;;  %9 = vst [vmem:[%s1300_s1 + $0x8] sm:$0xff] %v829_v42 }
   0xd   :  { %795 = vmatmul.msk.f32.vlgmr.msrb.gmra.mxu2 %vm80_vm5, %v288_v17  ;;  %797 = vmatmul.msk.f32.vlgmr.msrb.gmra.mxu3 %vm80_vm5, %v317_v18  ;;  %v127_v35 = vld [vmem:[%s1299_s0 + $0x50] sm:$0x3f]  ;;  %v827_v37 = vld [vmem:[%s1299_s0 + $0x58] ss:$0 sm:$0xff]  ;;  %v120_v38 = vsel %vm119_vm6, %v115_v33, 0.0  ;;  %v126_v40 = vld [vmem:[%s1299_s0 + $0x48] sm:$0xff] }
   0xe   :  { %806 = vmatpush.msk.msrb.mxu2 %vm52_vm0, %v464_v19  ;;  %808 = vmatpush.msk.msrb.mxu3 %vm52_vm0, %v493_v20  ;;  %v41_v39 = vsel %vm40_vm7, %v39_v34, 0.0  ;;  %v110_v41 = vld [vmem:[%s1299_s0 + $0x30] sm:$0xff]  ;;  %v131_v44 = vmul.f32 %v827_v37, %v127_v35  ;;  %v698_v46 = vld [vmem:[%s1299_s0 + $0x158] sm:$0xff]  ;;  %10 = vst [vmem:[%s1300_s1 + $0x10] sm:$0xff] %v829_v42  ;;  %v130_v49 = vmul.f32 %v827_v37, %v126_v40  ;;  %v719_v55 = vld [vmem:[%s1299_s0 + $0x180] sm:$0x1f] }
   0xf   :  { %v828_v45 = vld [vmem:[%s1299_s0 + $0x170] ss:$0 sm:$0xff]  ;;  %121 = vadd.xlane.f32.xlu1 %v120_v38  ;;  %42 = vadd.xlane.f32.xlu0 %v41_v39  ;;  %v114_v50 = vmul.f32 %v826_v28, %v110_v41  ;;  %11 = vst [vmem:[%s1300_s1 + $0x18] sm:$0xff] %v829_v42  ;;  %v463_v51 = vld [vmem:[%s1299_s0 + $0xf5] sm:$0x1f]  ;;  %v700_v59 = vld [vmem:[%s1299_s0 + $0x168] sm:$0xff] }
  0x10   :  { %793 = vmatmul.msk.f32.vlgmr.msrb.gmra.mxu1 %vm80_vm5, %v258_v21  ;;  %v206_v47 = vld [vmem:[%s1299_s0 + $0x90] sm:$0xff]  ;;  %v136_v48 = vsel %vm135_vm8, %v131_v44, 0.0  ;;  %12 = vst [vmem:[%s1300_s1 + $0x20] sm:$0xff] %v829_v42  ;;  %v492_v52 = vld [vmem:[%s1299_s0 + $0xfa] sm:$0x1f]  ;;  %v703_v53 = vmul.f32 %v828_v45, %v698_v46  ;;  %v132_v56 = vsel %vm80_vm5, %v130_v49, 0.0  ;;  %v705_v0 = vmul.f32 %v828_v45, %v700_v59 }
  0x11   :  { %804 = vmatpush.msk.msrb.mxu1 %vm52_vm0, %v434_v22  ;;  %137 = vadd.xlane.f32.xlu2 %v136_v48  ;;  %13 = vst [vmem:[%s1300_s1 + $0x28] sm:$0xff] %v829_v42  ;;  %v667_v54 = vld [vmem:[%s1299_s0 + $0x150] sm:$0x7f]  ;;  %v116_v57 = vsel %vm48_vm1, %v114_v50, 0.0  ;;  %v699_v60 = vld [vmem:[%s1299_s0 + $0x160] sm:$0xff]  ;;  %vm668_vm10 = vcmask 56320  }
  0x12   :  { %14 = vst [vmem:[%s1300_s1 + $0x30] sm:$0xff] %v829_v42  ;;  %v433_v58 = vld [vmem:[%s1299_s0 + $0xf0] sm:$0x1f]  ;;  %v638_v61 = vld [vmem:[%s1299_s0 + $0x13f] sm:$0x1f]  ;;  %v706_v62 = vsel %vm80_vm5, %v703_v53, 0.0  ;;  %v704_v1 = vmul.f32 %v828_v45, %v699_v60 }
  0x13   :  { %789 = vmatmul.msk.f32.gmra.mxu0 %vm48_vm1, %v205_v23  ;;  %15 = vst [vmem:[%s1300_s1 + $0x38] sm:$0xff] %v829_v42  ;;  %v207_v63 = vld [vmem:[%s1299_s0 + $0x98] sm:$0x3f]  ;;  %v550_v2 = vld [vmem:[%s1299_s0 + $0x120] sm:$0xf]  ;;  %v712_v4 = vsel %vm80_vm5, %v705_v0, 0.0 }
  0x14   :  { %16 = vst [vmem:[%s1300_s1 + $0x40] sm:$0xff] %v829_v42  ;;  %v579_v3 = vld [vmem:[%s1299_s0 + $0x124] sm:$0xf]  ;;  %v709_v5 = vsel %vm80_vm5, %v704_v1, 0.0  ;;  %v521_v6 = vld [vmem:[%s1299_s0 + $0xff] sm:$0x1f] }
  0x15   :  { %801 = vmatmul.msk.f32.vlgmr.msra.gmra.mxu2 %vm80_vm5, %v375_v25  ;;  %803 = vmatmul.msk.f32.vlgmr.msra.gmra.mxu3 %vm80_vm5, %v404_v27  ;;  %17 = vst [vmem:[%s1300_s1 + $0x48] sm:$0xff] %v829_v42  ;;  %v608_v7 = vld [vmem:[%s1299_s0 + $0x128] sm:$0xf]  ;;  %v718_v9 = vld [vmem:[%s1299_s0 + $0x178] sm:$0x3f]  ;;  %vm750_vm11 = vcmask 64512  }
  0x16   :  { %812 = vmatpush.msk.msra.mxu2 %vm84_vm4, %v551_v30  ;;  %814 = vmatpush.msk.msra.mxu3 %vm84_vm4, %v580_v32  ;;  %18 = vst [vmem:[%s1300_s1 + $0x50] sm:$0xff] %v829_v42  ;;  %v666_v8 = vld [vmem:[%s1299_s0 + $0x148] sm:$0x1]  ;;  %v637_v10 = vld [vmem:[%s1299_s0 + $0x12c] sm:$0xf]  ;;  %vm76_vm12 = vcmask 49152  }
  0x17   :  { %133 = vadd.xlane.f32.xlu1 %v132_v56  ;;  %117 = vadd.xlane.f32.xlu0 %v116_v57  ;;  %19 = vst [vmem:[%s1300_s1 + $0x58] sm:$0xff] %v829_v42  ;;  %v748_v11 = vld [vmem:[%s1299_s0 + $0x188] sm:$0xf]  ;;  %vm108_vm13 = vcmask 90112   ;;  %vm170_vm14 = vcmask 60416   ;;  %vm202_vm15 = vcmask 143360  }
  0x18   :  { %799 = vmatmul.msk.f32.vlgmr.msra.gmra.mxu1 %vm80_vm5, %v346_v36  ;;  %20 = vst [vmem:[%s1300_s1 + $0x60] sm:$0xff] %v829_v42  ;;  %vm286_vm2 = vcmask 44032   ;;  %vm461_vm6 = vcmask 167936   ;;  %vm746_vm7 = vcmask 46080  }
  0x19   :  { %810 = vmatpush.msk.msra.mxu1 %vm52_vm0, %v522_v43  ;;  %707 = vadd.xlane.f32.xlu2 %v706_v62  ;;  %21 = vst [vmem:[%s1300_s1 + $0x68] sm:$0xff] %v829_v42  ;;  %vm44_vm0 = vcmask 0  }
  0x1a   :  { %22 = vst [vmem:[%s1300_s1 + $0x70] sm:$0xff] %v829_v42 }
  0x1b   :  { %790 = vmatmul.msk.f32.gmra.mxu0 %vm48_vm1, %v206_v47  ;;  %23 = vst [vmem:[%s1300_s1 + $0x78] sm:$0xff] %v829_v42 }
  0x1c   :  { %24 = vst [vmem:[%s1300_s1 + $0x80] sm:$0xff] %v829_v42 }
  0x1d   :  { %807 = vmatmul.msk.f32.vlgmr.msrb.gmra.mxu2 %vm48_vm1, %v463_v51  ;;  %809 = vmatmul.msk.f32.vlgmr.msrb.gmra.mxu3 %vm48_vm1, %v492_v52  ;;  %25 = vst [vmem:[%s1300_s1 + $0x88] sm:$0xff] %v829_v42 }
  0x1e   :  { %820 = vmatpush.msk.msrb.mxu2 %vm672_vm9, %v667_v54  ;;  %822 = vmatpush.msk.msrb.mxu3 %vm84_vm4, %v719_v55  ;;  %26 = vst [vmem:[%s1300_s1 + $0x90] sm:$0xff] %v829_v42 }
  0x1f   :  { %713 = vadd.xlane.f32.xlu1 %v712_v4  ;;  %710 = vadd.xlane.f32.xlu0 %v709_v5  ;;  %27 = vst [vmem:[%s1300_s1 + $0x98] sm:$0xff] %v829_v42 }
  0x20   :  { %805 = vmatmul.msk.f32.vlgmr.msrb.gmra.mxu1 %vm48_vm1, %v433_v58  ;;  %28 = vst [vmem:[%s1300_s1 + $0xa0] sm:$0xff] %v829_v42 }
  0x21   :  { %818 = vmatpush.msk.msrb.mxu1 %vm84_vm4, %v638_v61  ;;  %29 = vst [vmem:[%s1300_s1 + $0xa8] sm:$0xff] %v829_v42  ;;  %vm140_vm4 = vcmask 5120  }
  0x22   :  { %30 = vst [vmem:[%s1300_s1 + $0xb0] sm:$0xff] %v829_v42 }
  0x23   :  { %791 = vmatmul.msk.f32.gmra.mxu0 %vm48_vm1, %v207_v63  ;;  %31 = vst [vmem:[%s1300_s1 + $0xb8] sm:$0xff] %v829_v42 }
  0x24   :  { %32 = vst [vmem:[%s1300_s1 + $0xc0] sm:$0xff] %v829_v42 }
  0x25   :  { %813 = vmatmul.msk.f32.vlgmr.msra.gmra.mxu2 %vm80_vm5, %v550_v2  ;;  %815 = vmatmul.msk.f32.vlgmr.msra.gmra.mxu3 %vm80_vm5, %v579_v3  ;;  %33 = vst [vmem:[%s1300_s1 + $0xc8] sm:$0xff] %v829_v42 }
  0x26   :  { %34 = vst [vmem:[%s1300_s1 + $0xd0] sm:$0xff] %v829_v42 }
  0x27   :  { %35 = vst [vmem:[%s1300_s1 + $0xd8] sm:$0xff] %v829_v42 }
  0x28   :  { %811 = vmatmul.msk.f32.vlgmr.msra.gmra.mxu1 %vm48_vm1, %v521_v6  ;;  %36 = vst [vmem:[%s1300_s1 + $0xe0] sm:$0xff] %v829_v42 }
  0x2b   :  { %817 = vmatmul.msk.f32.vlgmr.msra.gmra.mxu0 %vm80_vm5, %v608_v7 }
  0x2d   :  { %821 = vmatmul.msk.f32.vlgmr.msrb.gmra.mxu2 %vm668_vm10, %v666_v8  ;;  %823 = vmatmul.msk.f32.vlgmr.msrb.gmra.mxu3 %vm80_vm5, %v718_v9 }
  0x30   :  { %819 = vmatmul.msk.f32.vlgmr.msrb.gmra.mxu1 %vm80_vm5, %v637_v10  ;;  %vm123_vm5 = vcmask 7168  }
  0x33   :  { %824 = vmatmul.msk.f32.vlgmr.msrb.gmra.mxu0 %vm750_vm11, %v748_v11 }
  0x80   :  { %v73_v12 = vpop.f32.mrf.mxu0 }
  0x81   :  { %77 = vst.msk [vmem:[%s1300_s1 + $0x8] sm:$0x1] %vm76_vm12, %v73_v12 }
  0x82   :  { %v122_v17 = vpop.xlane.xlu1 %121  ;;  %v43_v18 = vpop.xlane.xlu0 %42 }
  0x83   :  { %125 = vst.msk [vmem:[%s1300_s1 + $0x20] sm:$0x1] %vm44_vm0, %v122_v17 }
  0x84   :  { %v138_v19 = vpop.xlane.xlu2 %137  ;;  %45 = vst.msk [vmem:[%s1300_s1] sm:$0x1] %vm44_vm0, %v43_v18 }
  0x85   :  { %v105_v13 = vpop.f32.mrf.mxu1  ;;  %141 = vst.msk [vmem:[%s1300_s1 + $0x30] sm:$0x3f] %vm140_vm4, %v138_v19 }
  0x86   :  { %109 = vst.msk [vmem:[%s1300_s1 + $0x10] sm:$0x1] %vm108_vm13, %v105_v13 }
  0x88   :  { %v167_v14 = vpop.f32.mrf.mxu2  ;;  %v199_v15 = vpop.f32.mrf.mxu3 }
  0x89   :  { %171 = vst.msk [vmem:[%s1300_s1 + $0x38] sm:$0xf] %vm170_vm14, %v167_v14  ;;  %v241_v16 = vpop.f32.mrf.mxu0 }
  0x8a   :  { %203 = vst.msk [vmem:[%s1300_s1 + $0x40] sm:$0x1f] %vm202_vm15, %v199_v15  ;;  %v134_v24 = vpop.xlane.xlu1 %133  ;;  %v118_v25 = vpop.xlane.xlu0 %117 }
  0x8b   :  { %253 = vst.msk [vmem:[%s1300_s1 + $0x48] sm:$0xff] %vm174_vm3, %v241_v16 }
  0x8c   :  { %139 = vst.msk [vmem:[%s1300_s1 + $0x28] sm:$0xff] %vm123_vm5, %v134_v24  ;;  %v708_v26 = vpop.xlane.xlu2 %707 }
  0x8d   :  { %v283_v20 = vpop.f32.mrf.mxu1  ;;  %124 = vst.msk [vmem:[%s1300_s1 + $0x18] sm:$0xff] %vm123_vm5, %v118_v25 }
  0x8e   :  { %287 = vst.msk [vmem:[%s1300_s1 + $0x68] sm:$0xf] %vm286_vm2, %v283_v20 }
  0x8f   :  { %715 = vst.msk [vmem:[%s1300_s1 + $0xc0] sm:$0xff] %vm123_vm5, %v708_v26 }
  0x90   :  { %v313_v21 = vpop.f32.mrf.mxu2  ;;  %v342_v22 = vpop.f32.mrf.mxu3 }
  0x91   :  { %v244_v23 = vpop.f32.mrf.mxu0  ;;  %316 = vst.msk [vmem:[%s1300_s1 + $0x6c] sm:$0xf] %vm286_vm2, %v313_v21 }
  0x92   :  { %254 = vst.msk [vmem:[%s1300_s1 + $0x50] sm:$0xff] %vm174_vm3, %v244_v23  ;;  %v714_v31 = vpop.xlane.xlu1 %713  ;;  %v711_v32 = vpop.xlane.xlu0 %710 }
  0x93   :  { %345 = vst.msk [vmem:[%s1300_s1 + $0x70] sm:$0xf] %vm286_vm2, %v342_v22 }
  0x94   :  { %717 = vst.msk [vmem:[%s1300_s1 + $0xd0] sm:$0xff] %vm123_vm5, %v714_v31 }
  0x95   :  { %v371_v27 = vpop.f32.mrf.mxu1  ;;  %716 = vst.msk [vmem:[%s1300_s1 + $0xc8] sm:$0xff] %vm123_vm5, %v711_v32 }
  0x96   :  { %374 = vst.msk [vmem:[%s1300_s1 + $0x78] sm:$0xff] %vm48_vm1, %v371_v27 }
  0x98   :  { %v400_v28 = vpop.f32.mrf.mxu2  ;;  %v429_v29 = vpop.f32.mrf.mxu3 }
  0x99   :  { %v247_v30 = vpop.f32.mrf.mxu0  ;;  %403 = vst.msk [vmem:[%s1300_s1 + $0x80] sm:$0xff] %vm48_vm1, %v400_v28 }
  0x9a   :  { %255 = vst.msk [vmem:[%s1300_s1 + $0x58] sm:$0xff] %vm174_vm3, %v247_v30  ;;  %vm256_vm3 = vcmask 29696  }
  0x9b   :  { %432 = vst.msk [vmem:[%s1300_s1 + $0x88] sm:$0xff] %vm48_vm1, %v429_v29  ;;  %vm696_vm1 = vcmask 188416  }
  0x9d   :  { %v458_v33 = vpop.f32.mrf.mxu1 }
  0x9e   :  { %462 = vst.msk [vmem:[%s1300_s1 + $0x90] sm:$0x1f] %vm461_vm6, %v458_v33 }
  0xa0   :  { %v488_v34 = vpop.f32.mrf.mxu2  ;;  %v517_v35 = vpop.f32.mrf.mxu3 }
  0xa1   :  { %491 = vst.msk [vmem:[%s1300_s1 + $0x95] sm:$0x1f] %vm461_vm6, %v488_v34  ;;  %v250_v36 = vpop.f32.mrf.mxu0 }
  0xa2   :  { %520 = vst.msk [vmem:[%s1300_s1 + $0x9a] sm:$0x1f] %vm461_vm6, %v517_v35 }
  0xa3   :  { %257 = vst.msk [vmem:[%s1300_s1 + $0x60] sm:$0x3f] %vm256_vm3, %v250_v36 }
  0xa5   :  { %v546_v37 = vpop.f32.mrf.mxu1 }
  0xa6   :  { %549 = vst.msk [vmem:[%s1300_s1 + $0x9f] sm:$0x1f] %vm461_vm6, %v546_v37 }
  0xa8   :  { %v575_v38 = vpop.f32.mrf.mxu2  ;;  %v604_v39 = vpop.f32.mrf.mxu3 }
  0xa9   :  { %578 = vst.msk [vmem:[%s1300_s1 + $0xa8] sm:$0xf] %vm286_vm2, %v575_v38  ;;  %v633_v40 = vpop.f32.mrf.mxu0 }
  0xaa   :  { %607 = vst.msk [vmem:[%s1300_s1 + $0xac] sm:$0xf] %vm286_vm2, %v604_v39 }
  0xab   :  { %636 = vst.msk [vmem:[%s1300_s1 + $0xb0] sm:$0xf] %vm286_vm2, %v633_v40 }
  0xad   :  { %v662_v41 = vpop.f32.mrf.mxu1 }
  0xae   :  { %665 = vst.msk [vmem:[%s1300_s1 + $0xb4] sm:$0xf] %vm286_vm2, %v662_v41 }
  0xb0   :  { %v693_v42 = vpop.f32.mrf.mxu2  ;;  %v743_v43 = vpop.f32.mrf.mxu3 }
  0xb1   :  { %697 = vst.msk [vmem:[%s1300_s1 + $0xb8] sm:$0x1] %vm696_vm1, %v693_v42  ;;  %v771_v44 = vpop.f32.mrf.mxu0 }
  0xb2   :  { %747 = vst.msk [vmem:[%s1300_s1 + $0xd8] sm:$0x3f] %vm746_vm7, %v743_v43 }
  0xb3   :  { %774 = vst.msk [vmem:[%s1300_s1 + $0xe0] sm:$0xf] %vm286_vm2, %v771_v44 }

</bundles_post_ra>
